<compile_context>
chip_gen: v5e
topology: v5e:2x2
jax: 0.10.0
libtpu: 0.0.40
codegen_flags: <defaults>
</compile_context>

<pallas_src>
import math

import jax
import jax.numpy as jnp
from jax.experimental import pallas as pl
from jax.experimental.pallas import tpu as pltpu


# ----------------------------------------------------------------------------
# Kernel: o = x @ w + b  (x: (bm, bk), w: (bk, bn), b: (1, bn))
# ----------------------------------------------------------------------------
def _linear_bias_kernel(x_ref, w_ref, b_ref, o_ref, acc_ref):
    k = pl.program_id(2)

    @pl.when(k == 0)
    def _():
        acc_ref[...] = jnp.zeros_like(acc_ref)

    acc_ref[...] += jnp.dot(x_ref[...], w_ref[...],
                            preferred_element_type=jnp.float32)

    @pl.when(k == pl.num_programs(2) - 1)
    def _():
        o_ref[...] = (acc_ref[...] + b_ref[...]).astype(o_ref.dtype)


# ----------------------------------------------------------------------------
# Wrapper helpers
# ----------------------------------------------------------------------------
def _round_up(x, m):
    return (x + m - 1) // m * m


def _pad2(a, rows, cols):
    pr, pc = rows - a.shape[0], cols - a.shape[1]
    if pr == 0 and pc == 0:
        return a
    return jnp.pad(a, ((0, pr), (0, pc)))


def _linear_pallas(x, w_t, b, *, compute_dtype, block_m, block_n, block_k):
    """y = x @ w_t + b with x: (M, K), w_t: (K, N), b: (N,)."""
    M, K = x.shape
    N = w_t.shape[1]
    out_dtype = x.dtype

    # Tile sizes: collapse the batch axis (single i tile for typical RL
    # batches -> weights streamed from HBM exactly once), lane-aligned N / K.
    bm = block_m if block_m is not None else min(_round_up(M, 8), 1024)
    bn = block_n if block_n is not None else min(_round_up(N, 128), 512)
    bk = block_k if block_k is not None else min(_round_up(K, 128), 512)

    Mp, Np, Kp = _round_up(M, bm), _round_up(N, bn), _round_up(K, bk)

    # v7x megacore: if the grid would be 1x1xK, split N so both TCs get work.
    if block_n is None and Mp // bm == 1 and Np // bn == 1 and bn % 256 == 0:
        bn //= 2

    grid = (Mp // bm, Np // bn, Kp // bk)

    # Pad to lane-dense shapes (slice back at the end).  For a static layer the
    # weight padding / cast can be hoisted to parameter-creation time.
    xp = _pad2(x.astype(compute_dtype), Mp, Kp)
    wp = _pad2(w_t.astype(compute_dtype), Kp, Np)
    bp = jnp.pad(b.astype(jnp.float32), (0, Np - N)).reshape(1, Np)

    isz = jnp.dtype(compute_dtype).itemsize
    cost = pl.CostEstimate(
        flops=2 * Mp * Np * Kp,
        transcendentals=0,
        bytes_accessed=(isz * Mp * Kp * (Np // bn)      # x re-streamed per j
                        + isz * Kp * Np * (Mp // bm)    # W re-streamed per i
                        + 4 * Mp * Np + 4 * Np))

    out = pl.pallas_call(
        _linear_bias_kernel,
        out_shape=jax.ShapeDtypeStruct((Mp, Np), out_dtype),
        grid_spec=pltpu.PrefetchScalarGridSpec(
            num_scalar_prefetch=0,
            grid=grid,
            in_specs=[
                pl.BlockSpec((bm, bk), lambda i, j, k: (i, k)),   # x
                pl.BlockSpec((bk, bn), lambda i, j, k: (k, j)),   # W_eff^T (K,N)
                pl.BlockSpec((1, bn), lambda i, j, k: (0, j)),    # bias
            ],
            out_specs=pl.BlockSpec((bm, bn), lambda i, j, k: (i, j)),
            scratch_shapes=[pltpu.VMEM((bm, bn), jnp.float32)]),
        compiler_params=pltpu.CompilerParams(
            dimension_semantics=("parallel", "parallel", "arbitrary"),
            vmem_limit_bytes=32 * 1024 * 1024),
        cost_estimate=cost,
    )(xp, wp, bp)
    return out[:M, :N]


def noisy_linear(x, w_mu, w_sigma, b_mu, b_sigma, *, training=True, sigma=0.5,
                 noise_key=None, compute_dtype=jnp.bfloat16,
                 block_m=None, block_n=None, block_k=None):
    """Pallas implementation of NoisyLinear.forward.

    x:            (batch, in_features)
    w_mu/w_sigma: (out_features, in_features)
    b_mu/b_sigma: (out_features,)
    """
    if training:
        if noise_key is None:
            raise ValueError("training=True requires an explicit noise_key")
        kw, kb = jax.random.split(noise_key)
        # torch.normal(0, sigma, size) == sigma * standard normal.
        w_noise = sigma * jax.random.normal(kw, w_mu.shape, jnp.float32)
        b_noise = sigma * jax.random.normal(kb, b_mu.shape, jnp.float32)
        # Compose in f32; only the dot operands are cast to compute_dtype.
        w_eff = w_mu.astype(jnp.float32) + w_sigma.astype(jnp.float32) * w_noise
        b_eff = b_mu.astype(jnp.float32) + b_sigma.astype(jnp.float32) * b_noise
    else:
        w_eff = w_mu.astype(jnp.float32)
        b_eff = b_mu.astype(jnp.float32)

    # Store transposed (K, N) so the kernel is a plain NN matmul (no in-kernel
    # transpose).  TODO(synk): for static layers, cache padded/transposed/bf16
    # weights at parameter-creation time instead of redoing it per forward.
    w_t = jnp.transpose(w_eff)
    return _linear_pallas(x, w_t, b_eff, compute_dtype=compute_dtype,
                          block_m=block_m, block_n=block_n, block_k=block_k)


def init_noisy_linear_params(key, in_features, out_features):
    """kaiming_uniform_(a=sqrt(5)) -> U(-1/sqrt(fan_in), 1/sqrt(fan_in)); zero biases."""
    k1, k2 = jax.random.split(key)
    bound = 1.0 / math.sqrt(in_features)
    w_mu = jax.random.uniform(k1, (out_features, in_features), jnp.float32,
                              minval=-bound, maxval=bound)
    w_sigma = jax.random.uniform(k2, (out_features, in_features), jnp.float32,
                                 minval=-bound, maxval=bound)
    b_mu = jnp.zeros((out_features,), jnp.float32)
    b_sigma = jnp.zeros((out_features,), jnp.float32)
    return w_mu, w_sigma, b_mu, b_sigma


def _ref_forward(x, w_mu, w_sigma, b_mu, b_sigma, sigma, noise_key):
    """Pure-JAX reference of the training forward (same noise stream)."""
    kw, kb = jax.random.split(noise_key)
    w_noise = sigma * jax.random.normal(kw, w_mu.shape, jnp.float32)
    b_noise = sigma * jax.random.normal(kb, b_mu.shape, jnp.float32)
    w = w_mu + w_sigma * w_noise
    b = b_mu + b_sigma * b_noise
    return x @ w.T + b, w, b


if __name__ == "__main__":
    key = jax.random.PRNGKey(0)
    k_p1, k_x1, k_n1, k_p2, k_x2, k_n2, k_p3, k_x3, k_n3, k_p4, k_x4 = (
        jax.random.split(key, 11))

    # ---------------- Case A: aligned shapes, f32 compute (tight check) ------
    B, IN, OUT = 8, 128, 128
    w_mu, w_sigma, b_mu, b_sigma = init_noisy_linear_params(k_p1, IN, OUT)
    x = jax.random.normal(k_x1, (B, IN), jnp.float32)

    y_eval = jax.block_until_ready(
        noisy_linear(x, w_mu, w_sigma, b_mu, b_sigma, training=False,
                     compute_dtype=jnp.float32))
    assert y_eval.shape == (B, OUT)
    assert jnp.allclose(y_eval, x @ w_mu.T + b_mu, atol=1e-4, rtol=1e-4)

    y_tr = jax.block_until_ready(
        noisy_linear(x, w_mu, w_sigma, b_mu, b_sigma, training=True,
                     sigma=0.5, noise_key=k_n1, compute_dtype=jnp.float32))
    ref_tr, _, _ = _ref_forward(x, w_mu, w_sigma, b_mu, b_sigma, 0.5, k_n1)
    assert jnp.allclose(y_tr, ref_tr, atol=1e-4, rtol=1e-4)
    # Deterministic given the same key; different with a different key.
    y_tr_again = jax.block_until_ready(
        noisy_linear(x, w_mu, w_sigma, b_mu, b_sigma, training=True,
                     sigma=0.5, noise_key=k_n1, compute_dtype=jnp.float32))
    assert jnp.allclose(y_tr, y_tr_again)
    y_tr_other = jax.block_until_ready(
        noisy_linear(x, w_mu, w_sigma, b_mu, b_sigma, training=True,
                     sigma=0.5, noise_key=jax.random.PRNGKey(123),
                     compute_dtype=jnp.float32))
    assert not jnp.allclose(y_tr, y_tr_other)

    # ---------------- Case B: unaligned shapes (pad + slice path) ------------
    B2, IN2, OUT2 = 2, 32, 64
    w_mu2, w_sigma2, b_mu2, b_sigma2 = init_noisy_linear_params(k_p2, IN2, OUT2)
    x2 = jax.random.normal(k_x2, (B2, IN2), jnp.float32)
    y2_eval = jax.block_until_ready(
        noisy_linear(x2, w_mu2, w_sigma2, b_mu2, b_sigma2, training=False,
                     compute_dtype=jnp.float32))
    assert y2_eval.shape == (B2, OUT2)
    assert jnp.allclose(y2_eval, x2 @ w_mu2.T + b_mu2, atol=1e-4, rtol=1e-4)
    y2_tr = jax.block_until_ready(
        noisy_linear(x2, w_mu2, w_sigma2, b_mu2, b_sigma2, training=True,
                     sigma=0.5, noise_key=k_n2, compute_dtype=jnp.float32))
    ref2_tr, _, _ = _ref_forward(x2, w_mu2, w_sigma2, b_mu2, b_sigma2, 0.5, k_n2)
    assert jnp.allclose(y2_tr, ref2_tr, atol=1e-4, rtol=1e-4)

    # ------------- Case C: multi-step grid + bf16 operands -------------------
    B3, IN3, OUT3 = 16, 256, 256
    w_mu3, w_sigma3, b_mu3, b_sigma3 = init_noisy_linear_params(k_p3, IN3, OUT3)
    x3 = jax.random.normal(k_x3, (B3, IN3), jnp.float32)
    y3_tr = jax.block_until_ready(
        noisy_linear(x3, w_mu3, w_sigma3, b_mu3, b_sigma3, training=True,
                     sigma=0.5, noise_key=k_n3, compute_dtype=jnp.bfloat16,
                     block_m=16, block_n=128, block_k=128))
    _, w3_eff, b3_eff = _ref_forward(x3, w_mu3, w_sigma3, b_mu3, b_sigma3,
                                     0.5, k_n3)
    # Reference with the same bf16 operand rounding (accumulation stays f32).
    ref3_bf16 = (x3.astype(jnp.bfloat16).astype(jnp.float32)
                 @ w3_eff.astype(jnp.bfloat16).astype(jnp.float32).T) + b3_eff
    assert bool(jnp.all(jnp.isfinite(y3_tr)))
    assert jnp.allclose(y3_tr, ref3_bf16, atol=1e-2, rtol=1e-2)

    # ------------- Case D: default tiles + megacore N split (bf16) -----------
    B4, IN4, OUT4 = 4, 512, 512
    w_mu4, w_sigma4, b_mu4, b_sigma4 = init_noisy_linear_params(k_p4, IN4, OUT4)
    x4 = jax.random.normal(k_x4, (B4, IN4), jnp.float32)
    y4_eval = jax.block_until_ready(
        noisy_linear(x4, w_mu4, w_sigma4, b_mu4, b_sigma4, training=False))
    ref4_bf16 = (x4.astype(jnp.bfloat16).astype(jnp.float32)
                 @ w_mu4.astype(jnp.bfloat16).astype(jnp.float32).T) + b_mu4
    assert jnp.allclose(y4_eval, ref4_bf16, atol=1e-2, rtol=1e-2)

    print("KERNEL_OK")
</pallas_src>

<mosaic_0001>
module attributes {stable_mosaic.version = 11 : i64} {
  func.func @_linear_bias_kernel(%arg0: i32, %arg1: i32, %arg2: i32, %arg3: memref<8x128xf32, #tpu.memory_space<vmem>>, %arg4: memref<128x128xf32, #tpu.memory_space<vmem>>, %arg5: memref<1x128xf32, #tpu.memory_space<vmem>>, %arg6: memref<8x128xf32, #tpu.memory_space<vmem>>, %arg7: memref<8x128xf32, #tpu.memory_space<vmem>>) attributes {dimension_semantics = [#tpu.dimension_semantics<parallel>, #tpu.dimension_semantics<parallel>, #tpu.dimension_semantics<arbitrary>], iteration_bounds = array<i64: 1, 1, 1>, scalar_prefetch = 0 : i64, scratch_operands = 1 : i64, tpu.core_type = #tpu.core_type<tc>, window_params = [{transform_indices = @transform_0, window_bounds = array<i64: 8, 128>}, {transform_indices = @transform_1, window_bounds = array<i64: 128, 128>}, {transform_indices = @transform_2, window_bounds = array<i64: 1, 128>}, {transform_indices = @transform_3, window_bounds = array<i64: 8, 128>}]} {
    %c0_i32 = arith.constant 0 : i32
    %0 = arith.cmpi eq, %arg2, %c0_i32 : i32
    %1 = arith.extui %0 : i1 to i32
    %c0_i32_0 = arith.constant 0 : i32
    %2 = arith.cmpi ne, %1, %c0_i32_0 : i32
    scf.if %2 {
      %cst_10 = arith.constant 0.000000e+00 : f32
      %12 = vector.broadcast %cst_10 : f32 to vector<8x128xf32>
      %c0_11 = arith.constant 0 : index
      %c0_12 = arith.constant 0 : index
      %13 = vector.load %arg7[%c0_11, %c0_12] : memref<8x128xf32, #tpu.memory_space<vmem>>, vector<8x128xf32>
      tpu.vector_store %arg7[%c0_11, %c0_12], %12 {strides = array<i32>} : memref<8x128xf32, #tpu.memory_space<vmem>>, vector<8x128xf32>,
    } else {
    }
    %c0 = arith.constant 0 : index
    %c0_1 = arith.constant 0 : index
    %3 = vector.load %arg7[%c0, %c0_1] : memref<8x128xf32, #tpu.memory_space<vmem>>, vector<8x128xf32>
    %c0_2 = arith.constant 0 : index
    %c0_3 = arith.constant 0 : index
    %4 = vector.load %arg3[%c0_2, %c0_3] : memref<8x128xf32, #tpu.memory_space<vmem>>, vector<8x128xf32>
    %c0_4 = arith.constant 0 : index
    %c0_5 = arith.constant 0 : index
    %5 = vector.load %arg4[%c0_4, %c0_5] : memref<128x128xf32, #tpu.memory_space<vmem>>, vector<128x128xf32>
    %cst = arith.constant dense<0.000000e+00> : vector<8x128xf32>
    %6 = tpu.matmul %4, %5, %cst {dimension_numbers = #tpu.dot_dimension_numbers<[1], [0], [0], [1], [0, 0, 1, 1], [], []>} : vector<8x128xf32>, vector<128x128xf32>, vector<8x128xf32> -> vector<8x128xf32>
    %7 = arith.addf %3, %6 : vector<8x128xf32>
    %c0_6 = arith.constant 0 : index
    %c0_7 = arith.constant 0 : index
    %8 = vector.load %arg7[%c0_6, %c0_7] : memref<8x128xf32, #tpu.memory_space<vmem>>, vector<8x128xf32>
    tpu.vector_store %arg7[%c0_6, %c0_7], %7 {strides = array<i32>} : memref<8x128xf32, #tpu.memory_space<vmem>>, vector<8x128xf32>,
    %c0_i32_8 = arith.constant 0 : i32
    %9 = arith.cmpi eq, %arg2, %c0_i32_8 : i32
    %10 = arith.extui %9 : i1 to i32
    %c0_i32_9 = arith.constant 0 : i32
    %11 = arith.cmpi ne, %10, %c0_i32_9 : i32
    scf.if %11 {
      %c0_10 = arith.constant 0 : index
      %c0_11 = arith.constant 0 : index
      %12 = vector.load %arg7[%c0_10, %c0_11] : memref<8x128xf32, #tpu.memory_space<vmem>>, vector<8x128xf32>
      %c0_12 = arith.constant 0 : index
      %c0_13 = arith.constant 0 : index
      %13 = vector.load %arg5[%c0_12, %c0_13] : memref<1x128xf32, #tpu.memory_space<vmem>>, vector<1x128xf32>
      %14 = vector.broadcast %13 : vector<1x128xf32> to vector<8x128xf32>
      %15 = arith.addf %12, %14 : vector<8x128xf32>
      %c0_14 = arith.constant 0 : index
      %c0_15 = arith.constant 0 : index
      %16 = vector.load %arg6[%c0_14, %c0_15] : memref<8x128xf32, #tpu.memory_space<vmem>>, vector<8x128xf32>
      tpu.vector_store %arg6[%c0_14, %c0_15], %15 {strides = array<i32>} : memref<8x128xf32, #tpu.memory_space<vmem>>, vector<8x128xf32>,
    } else {
    }
    return
  }
  func.func @transform_0(%arg0: i32, %arg1: i32, %arg2: i32) -> (i32, i32) {
    %c0_i32 = arith.constant 0 : i32
    return %arg0, %arg2 : i32, i32
  }
  func.func @transform_1(%arg0: i32, %arg1: i32, %arg2: i32) -> (i32, i32) {
    %c0_i32 = arith.constant 0 : i32
    return %arg2, %arg1 : i32, i32
  }
  func.func @transform_2(%arg0: i32, %arg1: i32, %arg2: i32) -> (i32, i32) {
    %c0_i32 = arith.constant 0 : i32
    %c0_i32_0 = arith.constant 0 : i32
    return %c0_i32, %arg1 : i32, i32
  }
  func.func @transform_3(%arg0: i32, %arg1: i32, %arg2: i32) -> (i32, i32) {
    %c0_i32 = arith.constant 0 : i32
    return %arg0, %arg1 : i32, i32
  }
}

</mosaic_0001>

<bundles_post_ra>
// kernel: tpu_custom_call.1
= control target key start
LH: loop header
LB: loop body
LE: loop exit
PB: predicated region body
PF: predicated region fallthrough
CT: control target
= control target key end

     0   :  { %8 = vsyncpa [#allocation4], 0  ;;  %s239_s0 = inlined_call_operand.hbm [shape: f32[8,128], index: 0, kind: input, shape index: {}]   ;;  %s240_s1 = inlined_call_operand.hbm [shape: f32[128,128], index: 1, kind: input, shape index: {}]   ;;  %s241_s2 = inlined_call_operand.vmem [shape: f32[1,128], index: 2, kind: input, shape index: {}]   ;;  %s242_s3 = inlined_call_operand.hbm [shape: f32[8,128], index: 3, kind: output, shape index: {}]  }
   0x1   :  { %9 = vsyncpa [#allocation7], 0 }
   0x2   :  { %10 = vsyncpa [#allocation5], 0  ;;  %s16_s14 = sshll.u32 %s239_s0, 4  ;;  %s202_s15 = smov [#allocation3]   ;;  %s17_s14 = int_to_ptr.hbm [resolvable:$true] %s16_s14 }
   0x3   :  { %s18_s16 = sshll.u32 %s202_s15, 4  ;;  %s26_s19 = sshll.u32 %s240_s1, 4  ;;  %s19_s16 = int_to_ptr.vmem [resolvable:$true] %s18_s16  ;;  %s27_s19 = int_to_ptr.hbm [resolvable:$true] %s26_s19 }
   0x4   :  { %21 = dma.hbm_to_vmem [thread:$0]  %s17_s14, 128, %s19_s16, [#allocation4]  }
   0x5   :  { %s203_s20 = smov [#allocation6]   ;;  %s204_s22 = smov 128  }
   0x6   :  { %s28_s21 = sshll.u32 %s203_s20, 4  ;;  %s205_s23 = smov 8   ;;  %s29_s21 = int_to_ptr.vmem [resolvable:$true] %s28_s21 }
   0x7   :  { %34 = dma.hbm_to_vmem [thread:$0]  %s27_s19, 2048, %s29_s21, [#allocation7], %s204_s22, %s204_s22, %s205_s23  }
   0x8   :  { %196 = dma.done.wait [#allocation4], 128  }
   0x9   :  { %197 = vsyncadd [#allocation4], 4294967168 }
   0xa   :  { %198 = dma.done.wait [#allocation7], 2048  }
   0xb   :  { %199 = vsyncadd [#allocation7], 4294965248  ;;  %v67_v0 = vld [vmem:[#allocation6 + $0x78] sm:$0xff]  ;;  %v66_v1 = vld [vmem:[#allocation6 + $0x70] sm:$0xff]  ;;  %s206_s24 = smov [#allocation8]   ;;  %s107_s28 = sshll.u32 %s242_s3, 4  ;;  %s108_s28 = int_to_ptr.hbm [resolvable:$true] %s107_s28 }
   0xc   :  { %68 = vmatpush.msra.mxu0 %v67_v0  ;;  %v65_v2 = vld [vmem:[#allocation6 + $0x68] sm:$0xff]  ;;  %v64_v3 = vld [vmem:[#allocation6 + $0x60] sm:$0xff]  ;;  %v63_v4 = vld [vmem:[#allocation6 + $0x58] sm:$0xff]  ;;  %s105_s25 = sshll.u32 %s206_s24, 4  ;;  %s106_s25 = int_to_ptr.vmem [resolvable:$true] %s105_s25 }
   0xd   :  { %v62_v5 = vld [vmem:[#allocation6 + $0x50] sm:$0xff]  ;;  %v61_v6 = vld [vmem:[#allocation6 + $0x48] sm:$0xff]  ;;  %v60_v7 = vld [vmem:[#allocation6 + $0x40] sm:$0xff] }
   0xe   :  { %69 = vmatpush.msra.mxu0 %v66_v1  ;;  %v59_v8 = vld [vmem:[#allocation6 + $0x38] sm:$0xff]  ;;  %v58_v9 = vld [vmem:[#allocation6 + $0x30] sm:$0xff]  ;;  %v57_v10 = vld [vmem:[#allocation6 + $0x28] sm:$0xff] }
   0xf   :  { %v56_v11 = vld [vmem:[#allocation6 + $0x20] sm:$0xff]  ;;  %v55_v12 = vld [vmem:[#allocation6 + $0x18] sm:$0xff]  ;;  %v54_v13 = vld [vmem:[#allocation6 + $0x10] sm:$0xff] }
  0x10   :  { %70 = vmatpush.msra.mxu0 %v65_v2  ;;  %v53_v14 = vld [vmem:[#allocation6 + $0x8] sm:$0xff]  ;;  %v52_v15 = vld [vmem:[#allocation6] sm:$0xff]  ;;  %v51_v16 = vld [vmem:[#allocation3] sm:$0xff] }
  0x11   :  { %v123_v17 = vld [vmem:[%s241_s2] ss:$0 sm:$0xff] }
  0x12   :  { %71 = vmatpush.msra.mxu0 %v64_v3 }
  0x14   :  { %72 = vmatpush.msra.mxu0 %v63_v4 }
  0x16   :  { %73 = vmatpush.msra.mxu0 %v62_v5 }
  0x18   :  { %74 = vmatpush.msra.mxu0 %v61_v6 }
  0x1a   :  { %75 = vmatpush.msra.mxu0 %v60_v7 }
  0x1c   :  { %76 = vmatpush.msra.mxu0 %v59_v8 }
  0x1e   :  { %77 = vmatpush.msra.mxu0 %v58_v9 }
  0x20   :  { %78 = vmatpush.msra.mxu0 %v57_v10 }
  0x22   :  { %79 = vmatpush.msra.mxu0 %v56_v11 }
  0x24   :  { %80 = vmatpush.msra.mxu0 %v55_v12 }
  0x26   :  { %81 = vmatpush.msra.mxu0 %v54_v13 }
  0x28   :  { %82 = vmatpush.msra.mxu0 %v53_v14 }
  0x2a   :  { %83 = vmatpush.msra.mxu0 %v52_v15 }
  0x2b   :  { %84 = vmatmul.f32.vlgmr.msra.gmra.mxu0 %v51_v16 }
  0xa8   :  { %v85_v18 = vpop.f32.mrf.mxu0 }
  0xa9   :  { %v98_v19 = vadd.f32 %v123_v17, %v85_v18 }
  0xab   :  { %99 = vst [vmem:[#allocation8] sm:$0xff] %v98_v19 }
  0xac   :  { %110 = dma.vmem_to_hbm [thread:$0]  %s106_s25, 128, %s108_s28, [#allocation5]  }
  0xad   :  { %200 = dma.done.wait [#allocation5], 128  }
  0xae   :  { %201 = vsyncadd [#allocation5], 4294967168 }
  0xaf   :  { %115 = vsyncpa [#allocation4], 1 }
  0xb0   :  { %116 = vsyncpa [#allocation7], 1 }
  0xb1   :  { %117 = vsyncpa [#allocation5], 1 }

</bundles_post_ra>
